<compile_context>
chip_gen: v7x
topology: tpu7x:2x2x1
jax: 0.10.0
libtpu: 0.0.40
codegen_flags: <defaults>
</compile_context>

<pallas_src>
import jax
import jax.numpy as jnp
from jax.experimental import pallas as pl
from jax.experimental.pallas import tpu as pltpu


# ----------------------------------------------------------------------------
# Kernels
# ----------------------------------------------------------------------------
def _reward_head_masked_kernel(h_ref, m_ref, ic_ref, w_ref, out_ref, acc_ref):
    """Project-then-pool reward head, tiled over (B, S).

    h_ref   : (B_TILE, S_TILE, H)  hidden-state tile (backbone dtype, e.g. bf16)
    m_ref   : (B_TILE, S_TILE)     attention-mask tile, f32 {0, 1}
    ic_ref  : (B_TILE, 1)          1 / clamp(token_count, 1)           (f32)
    w_ref   : (1, H)               v_head weight, lane-dense           (f32)
    out_ref : (B_TILE, 1)          clamped reward values               (f32)
    acc_ref : (B_TILE, 1)          running masked score sum   (f32 VMEM scratch)
    """
    s = pl.program_id(1)

    @pl.when(s == 0)
    def _init():
        acc_ref[...] = jnp.zeros_like(acc_ref)

    h = h_ref[...]                                    # (Bt, St, H)
    w = w_ref[...].reshape(1, 1, -1)                  # (1, 1, H) f32, stationary
    m = m_ref[...]                                    # (Bt, St)  f32

    # v_head projection first (per-token scalar score), then the masked
    # S-reduction of those scalars.  The big hidden tile is streamed through
    # the VPU exactly once (never pushed as MXU weights) and the cross-tile
    # accumulator shrinks to (Bt, 1) f32.
    scores = jnp.sum(h.astype(jnp.float32) * w, axis=-1)            # (Bt, St)
    acc_ref[...] += jnp.sum(scores * m, axis=-1, keepdims=True)     # (Bt, 1)

    @pl.when(s == pl.num_programs(1) - 1)
    def _finalize():
        vals = acc_ref[...] * ic_ref[...]             # masked mean, projected
        out_ref[...] = jnp.clip(vals, -10.0, 10.0).astype(out_ref.dtype)


def _reward_head_last_token_kernel(h_ref, w_ref, out_ref):
    """attention_mask=None path: v_head on the last token's hidden state + clamp."""
    h = h_ref[...].astype(jnp.float32)                          # (Bt, H)
    vals = jnp.sum(h * w_ref[...], axis=-1, keepdims=True)      # (Bt, 1)
    out_ref[...] = jnp.clip(vals, -10.0, 10.0).astype(out_ref.dtype)


# ----------------------------------------------------------------------------
# Tile-size / VMEM helpers
# ----------------------------------------------------------------------------
def _round_up(x, m):
    return ((x + m - 1) // m) * m


def _vmem_capacity_bytes():
    try:
        return pltpu.get_tpu_info().vmem_capacity_bytes
    except Exception:
        return 128 << 20


def _block_target_bytes():
    # ~8 MiB hidden blocks amortize the ~0.35 us per-grid-step overhead even at
    # v7x's 3.2 TB/s HBM (64 MiB physical VMEM); the 128 MiB-VMEM generations
    # (v5e / v6e, slower HBM) take 16 MiB blocks.
    return (8 << 20) if _vmem_capacity_bytes() <= (64 << 20) else (16 << 20)


def _choose_b_tile(B):
    # B is the second-minor dim of the mask / output blocks, so a partial tile
    # must be a multiple of 8 (or the full extent).  b_tile=8 gives >=2 blocks
    # on the "parallel" B axis whenever B >= 16, keeping both v7x cores busy.
    return 8 if (B % 8 == 0 and B >= 16) else B


def _choose_s_tile(S, H, itemsize, b_tile, target_bytes):
    """Largest multiple of 128 dividing S that keeps the hidden block ~target."""
    assert S % 128 == 0
    rows = max(128, target_bytes // max(1, b_tile * H * itemsize))
    s_tile = min(S, (rows // 128) * 128)
    while S % s_tile:
        s_tile -= 128
    return max(s_tile, 128)


# ----------------------------------------------------------------------------
# Wrappers
# ----------------------------------------------------------------------------
def reward_head_masked(hidden_states, attention_mask, v_head_w, *,
                       b_tile=None, s_tile=None):
    """Masked-mean pool + v_head + clamp over (B, S, H) hidden states."""
    B0, S0, H = hidden_states.shape
    hdtype = hidden_states.dtype
    itemsize = jnp.dtype(hdtype).itemsize

    # Defensive alignment.  Callers are expected to pre-pad (reward_model_forward
    # pads the tiny id/mask arrays *before* the backbone, so no (B,S,H) copy
    # happens here); padded positions carry mask=0 -> no effect on the mean.
    S = _round_up(S0, 128)
    B = _round_up(B0, 8) if B0 > 8 else B0
    mask = attention_mask.astype(jnp.float32)
    if (B, S) != (B0, S0):
        hidden_states = jnp.pad(hidden_states, ((0, B - B0), (0, S - S0), (0, 0)))
        mask = jnp.pad(mask, ((0, B - B0), (0, S - S0)))

    if b_tile is None:
        b_tile = _choose_b_tile(B)
    target = _block_target_bytes()
    if s_tile is None:
        s_tile = _choose_s_tile(S, H, itemsize, b_tile, target)
    assert B % b_tile == 0 and S % s_tile == 0

    # Token count (and its reciprocal) depend only on the tiny (B, S) mask:
    # hoist them out of the kernel (drops the per-step count reduce, the count
    # scratch buffer and the finalize divide).  Matches torch.clamp(count, 1.0).
    count = jnp.maximum(jnp.sum(mask, axis=1, keepdims=True), 1.0)    # (B, 1)
    inv_count = (1.0 / count).astype(jnp.float32)

    w_row = v_head_w.astype(jnp.float32).reshape(1, H)

    grid = (B // b_tile, S // s_tile)

    # Scoped-VMEM budget: double-buffered hidden + mask blocks plus headroom.
    # Set unconditionally (8 MiB blocks already exceed v5e's 16 MiB default),
    # capped to leave room under v7x's 64 MiB physical VMEM for Mosaic scratch.
    h_block = b_tile * s_tile * H * itemsize
    m_block = max(8, b_tile) * s_tile * 4
    need = 2 * (h_block + m_block) + (8 << 20)
    cap = (48 << 20) if _vmem_capacity_bytes() <= (64 << 20) else (100 << 20)
    vmem_limit = int(min(max(need, 32 << 20), cap))

    out = pl.pallas_call(
        _reward_head_masked_kernel,
        out_shape=jax.ShapeDtypeStruct((B, 1), jnp.float32),
        grid_spec=pltpu.PrefetchScalarGridSpec(
            num_scalar_prefetch=0,
            grid=grid,
            in_specs=[
                pl.BlockSpec((b_tile, s_tile, H), lambda b, s: (b, s, 0)),
                pl.BlockSpec((b_tile, s_tile), lambda b, s: (b, s)),
                pl.BlockSpec((b_tile, 1), lambda b, s: (b, 0)),
                pl.BlockSpec((1, H), lambda b, s: (0, 0)),
            ],
            out_specs=pl.BlockSpec((b_tile, 1), lambda b, s: (b, 0)),
            scratch_shapes=[pltpu.VMEM((b_tile, 1), jnp.float32)]),
        compiler_params=pltpu.CompilerParams(
            dimension_semantics=("parallel", "arbitrary"),
            vmem_limit_bytes=vmem_limit),
    )(hidden_states, mask, inv_count, w_row)
    return out[:B0]


def reward_head_last_token(last_hidden, v_head_w):
    """v_head + clamp on pre-sliced last-token hidden states (B, H)."""
    B0, H = last_hidden.shape
    itemsize = jnp.dtype(last_hidden.dtype).itemsize
    target = _block_target_bytes()
    w_row = v_head_w.astype(jnp.float32).reshape(1, H)

    if B0 * H * itemsize <= target:
        # Whole batch in one grid step: a single DMA + dot, no per-step overhead.
        B, b_tile, x = B0, B0, last_hidden
    else:
        B = _round_up(B0, 8)
        x = jnp.pad(last_hidden, ((0, B - B0), (0, 0))) if B != B0 else last_hidden
        b_tile = max(8, min(B, (target // max(1, H * itemsize)) // 8 * 8))
        while B % b_tile:
            b_tile -= 8

    out = pl.pallas_call(
        _reward_head_last_token_kernel,
        out_shape=jax.ShapeDtypeStruct((B, 1), jnp.float32),
        grid_spec=pltpu.PrefetchScalarGridSpec(
            num_scalar_prefetch=0,
            grid=(B // b_tile,),
            in_specs=[pl.BlockSpec((b_tile, H), lambda b: (b, 0)),
                      pl.BlockSpec((1, H), lambda b: (0, 0))],
            out_specs=pl.BlockSpec((b_tile, 1), lambda b: (b, 0))),
        compiler_params=pltpu.CompilerParams(dimension_semantics=("parallel",)),
    )(x, w_row)
    return out[:B0]


# ----------------------------------------------------------------------------
# Synthetic "RewardModel" params + forward
# ----------------------------------------------------------------------------
def make_params(key, vocab_size, hidden_size, hidden_dtype=jnp.bfloat16):
    k_emb, k_vh = jax.random.split(key)
    # TODO(synk): the pretrained AutoModelForCausalLM backbone is replaced by a
    # deterministic synthetic (bf16) embedding table producing the last hidden states.
    emb_table = (jax.random.normal(k_emb, (vocab_size, hidden_size), jnp.float32)
                 * 0.02).astype(hidden_dtype)
    # nn.Linear(hidden, 1, bias=False).weight ~ N(0, 0.01); stored transposed (H, 1).
    v_head_w = jax.random.normal(k_vh, (hidden_size, 1), jnp.float32) * 0.01
    return {"emb_table": emb_table, "v_head_w": v_head_w}


def reward_model_forward(params, input_ids, attention_mask=None, *,
                         b_tile=None, s_tile=None):
    """Mirrors RewardModel.forward semantics (with a synthetic backbone)."""
    if attention_mask is None:
        # Only the last token's hidden state is ever used: gather just (B, H)
        # instead of materializing (B, S, H) and slicing -- an S-fold cut in
        # HBM traffic for this path.
        last_hidden = params["emb_table"][input_ids[:, -1]]
        return reward_head_last_token(last_hidden, params["v_head_w"])

    B, S = input_ids.shape
    # Pad the tiny (B, S) id/mask arrays BEFORE the backbone so the (B, S, H)
    # hidden tensor is born tile-aligned (8 sublanes / 128 lanes): padded
    # positions carry mask=0 (no effect on the pooled mean) and no full-tensor
    # pad copy or full-extent fallback block is ever needed downstream.
    S_pad = _round_up(S, 128)
    B_pad = _round_up(B, 8) if B > 8 else B
    ids, mask = input_ids, attention_mask
    if (B_pad, S_pad) != (B, S):
        ids = jnp.pad(ids, ((0, B_pad - B), (0, S_pad - S)))
        mask = jnp.pad(mask, ((0, B_pad - B), (0, S_pad - S)))

    # "Base model" stand-in -> last hidden states (B, S, H), kept in the
    # backbone dtype (bf16) so the kernel streams half the HBM bytes.
    # TODO(synk): for a real backbone this lookup does not exist (hidden states
    # come out of the transformer); for the synthetic stand-in the remaining
    # win is fusing the row gather into the kernel (scalar-prefetch ids +
    # per-row DMA gather from an HBM-resident table) to avoid one extra full
    # HBM round-trip of (B, S, H).
    hidden_states = params["emb_table"][ids]
    vals = reward_head_masked(hidden_states, mask, params["v_head_w"],
                              b_tile=b_tile, s_tile=s_tile)
    return vals[:B]


# ----------------------------------------------------------------------------
# Pure-JAX reference (f32 math, pool-then-project exactly as in torch)
# ----------------------------------------------------------------------------
def reward_model_ref(params, input_ids, attention_mask=None):
    hidden = params["emb_table"][input_ids].astype(jnp.float32)
    H = hidden.shape[-1]
    w = params["v_head_w"].astype(jnp.float32).reshape(1, H)
    if attention_mask is not None:
        m = attention_mask.astype(jnp.float32)
        summed = jnp.sum(hidden * m[..., None], axis=1)
        count = jnp.maximum(jnp.sum(m, axis=1, keepdims=True), 1.0)
        pooled = summed / count
        vals = jnp.sum(pooled * w, axis=-1, keepdims=True)
    else:
        vals = jnp.sum(hidden[:, -1, :] * w, axis=-1, keepdims=True)
    return jnp.clip(vals, -10.0, 10.0)


if __name__ == "__main__":
    B, S, H, VOCAB = 2, 256, 128, 512

    key = jax.random.PRNGKey(0)
    k_params, k_ids = jax.random.split(key)

    params = make_params(k_params, VOCAB, H)
    input_ids = jax.random.randint(k_ids, (B, S), 0, VOCAB, dtype=jnp.int32)

    # Row 0 fully attended; row 1 right-padded after token 100.
    lengths = jnp.array([[S], [100]], dtype=jnp.int32)
    attention_mask = (jnp.arange(S, dtype=jnp.int32)[None, :] < lengths
                      ).astype(jnp.int32)

    # Masked path, forcing two S tiles so the cross-tile f32 accumulator path
    # (@pl.when init / finalize) is exercised.
    vals_masked = jax.block_until_ready(
        reward_model_forward(params, input_ids, attention_mask, s_tile=128))

    # Masked path with the auto-picked tile size (single S step at this size).
    vals_masked_auto = jax.block_until_ready(
        reward_model_forward(params, input_ids, attention_mask))

    # Ragged S (not a multiple of 128): exercises the cheap pre-backbone padding.
    ids_ragged = input_ids[:, :200]
    mask_ragged = attention_mask[:, :200]
    vals_ragged = jax.block_until_ready(
        reward_model_forward(params, ids_ragged, mask_ragged))

    # Last-token (attention_mask=None) path: only (B, H) hidden ever moves.
    vals_last = jax.block_until_ready(
        reward_model_forward(params, input_ids, None))

    ref_masked = reward_model_ref(params, input_ids, attention_mask)
    ref_ragged = reward_model_ref(params, ids_ragged, mask_ragged)
    ref_last = reward_model_ref(params, input_ids, None)

    assert vals_masked.shape == (B, 1) and vals_last.shape == (B, 1)
    assert jnp.allclose(vals_masked, ref_masked, atol=1e-5, rtol=1e-4)
    assert jnp.allclose(vals_masked_auto, ref_masked, atol=1e-5, rtol=1e-4)
    assert jnp.allclose(vals_ragged, ref_ragged, atol=1e-5, rtol=1e-4)
    assert jnp.allclose(vals_last, ref_last, atol=1e-5, rtol=1e-4)

    print("KERNEL_OK")
</pallas_src>

<mosaic_0001>
module attributes {stable_mosaic.version = 11 : i64} {
  func.func @_reward_head_masked_kernel(%arg0: i32, %arg1: i32, %arg2: memref<2x128x128xbf16, #tpu.memory_space<vmem>>, %arg3: memref<2x128xf32, #tpu.memory_space<vmem>>, %arg4: memref<2x1xf32, #tpu.memory_space<vmem>>, %arg5: memref<1x128xf32, #tpu.memory_space<vmem>>, %arg6: memref<2x1xf32, #tpu.memory_space<vmem>>, %arg7: memref<2x1xf32, #tpu.memory_space<vmem>>) attributes {dimension_semantics = [#tpu.dimension_semantics<parallel>, #tpu.dimension_semantics<arbitrary>], iteration_bounds = array<i64: 1, 2>, scalar_prefetch = 0 : i64, scratch_operands = 1 : i64, tpu.core_type = #tpu.core_type<tc>, window_params = [{transform_indices = @transform_0, window_bounds = array<i64: 2, 128, 128>}, {transform_indices = @transform_1, window_bounds = array<i64: 2, 128>}, {transform_indices = @transform_2, window_bounds = array<i64: 2, 1>}, {pipeline_mode = #tpu.pipeline_mode<synchronous>, transform_indices = @transform_3, window_bounds = array<i64: 1, 128>}, {transform_indices = @transform_4, window_bounds = array<i64: 2, 1>}]} {
    %c0_i32 = arith.constant 0 : i32
    %0 = arith.cmpi eq, %arg1, %c0_i32 : i32
    %1 = arith.extui %0 : i1 to i32
    %c0_i32_0 = arith.constant 0 : i32
    %2 = arith.cmpi ne, %1, %c0_i32_0 : i32
    scf.if %2 {
      %cst_13 = arith.constant 0.000000e+00 : f32
      %20 = vector.broadcast %cst_13 : f32 to vector<2x1xf32>
      %c0_14 = arith.constant 0 : index
      %c0_15 = arith.constant 0 : index
      %21 = vector.load %arg7[%c0_14, %c0_15] : memref<2x1xf32, #tpu.memory_space<vmem>>, vector<2x1xf32>
      tpu.vector_store %arg7[%c0_14, %c0_15], %20 {strides = array<i32>} : memref<2x1xf32, #tpu.memory_space<vmem>>, vector<2x1xf32>,
    } else {
    }
    %c0 = arith.constant 0 : index
    %c0_1 = arith.constant 0 : index
    %c0_2 = arith.constant 0 : index
    %3 = vector.load %arg2[%c0, %c0_1, %c0_2] : memref<2x128x128xbf16, #tpu.memory_space<vmem>>, vector<2x128x128xbf16>
    %c0_3 = arith.constant 0 : index
    %c0_4 = arith.constant 0 : index
    %4 = vector.load %arg5[%c0_3, %c0_4] : memref<1x128xf32, #tpu.memory_space<vmem>>, vector<1x128xf32>
    %5 = vector.shape_cast %4 : vector<1x128xf32> to vector<1x1x128xf32>
    %c0_5 = arith.constant 0 : index
    %c0_6 = arith.constant 0 : index
    %6 = vector.load %arg3[%c0_5, %c0_6] : memref<2x128xf32, #tpu.memory_space<vmem>>, vector<2x128xf32>
    %7 = arith.extf %3 : vector<2x128x128xbf16> to vector<2x128x128xf32>
    %8 = vector.broadcast %5 : vector<1x1x128xf32> to vector<2x128x128xf32>
    %9 = arith.mulf %7, %8 : vector<2x128x128xf32>
    %cst = arith.constant dense<0.000000e+00> : vector<2x128xf32>
    %10 = vector.multi_reduction <add>, %9, %cst [2] : vector<2x128x128xf32> to vector<2x128xf32>
    %c0_7 = arith.constant 0 : index
    %c0_8 = arith.constant 0 : index
    %11 = vector.load %arg7[%c0_7, %c0_8] : memref<2x1xf32, #tpu.memory_space<vmem>>, vector<2x1xf32>
    %12 = arith.mulf %10, %6 : vector<2x128xf32>
    %cst_9 = arith.constant dense<0.000000e+00> : vector<2xf32>
    %13 = vector.multi_reduction <add>, %12, %cst_9 [1] : vector<2x128xf32> to vector<2xf32>
    %14 = vector.shape_cast %13 : vector<2xf32> to vector<2x1xf32>
    %15 = arith.addf %11, %14 : vector<2x1xf32>
    %c0_10 = arith.constant 0 : index
    %c0_11 = arith.constant 0 : index
    %16 = vector.load %arg7[%c0_10, %c0_11] : memref<2x1xf32, #tpu.memory_space<vmem>>, vector<2x1xf32>
    tpu.vector_store %arg7[%c0_10, %c0_11], %15 {strides = array<i32>} : memref<2x1xf32, #tpu.memory_space<vmem>>, vector<2x1xf32>,
    %c1_i32 = arith.constant 1 : i32
    %17 = arith.cmpi eq, %arg1, %c1_i32 : i32
    %18 = arith.extui %17 : i1 to i32
    %c0_i32_12 = arith.constant 0 : i32
    %19 = arith.cmpi ne, %18, %c0_i32_12 : i32
    scf.if %19 {
      %c0_13 = arith.constant 0 : index
      %c0_14 = arith.constant 0 : index
      %20 = vector.load %arg7[%c0_13, %c0_14] : memref<2x1xf32, #tpu.memory_space<vmem>>, vector<2x1xf32>
      %c0_15 = arith.constant 0 : index
      %c0_16 = arith.constant 0 : index
      %21 = vector.load %arg4[%c0_15, %c0_16] : memref<2x1xf32, #tpu.memory_space<vmem>>, vector<2x1xf32>
      %22 = arith.mulf %20, %21 : vector<2x1xf32>
      %cst_17 = arith.constant -1.000000e+01 : f32
      %cst_18 = arith.constant 1.000000e+01 : f32
      %23 = vector.broadcast %cst_17 : f32 to vector<2x1xf32>
      %24 = arith.maximumf %23, %22 : vector<2x1xf32>
      %25 = vector.broadcast %cst_18 : f32 to vector<2x1xf32>
      %26 = arith.minimumf %25, %24 : vector<2x1xf32>
      %c0_19 = arith.constant 0 : index
      %c0_20 = arith.constant 0 : index
      %27 = vector.load %arg6[%c0_19, %c0_20] : memref<2x1xf32, #tpu.memory_space<vmem>>, vector<2x1xf32>
      tpu.vector_store %arg6[%c0_19, %c0_20], %26 {strides = array<i32>} : memref<2x1xf32, #tpu.memory_space<vmem>>, vector<2x1xf32>,
    } else {
    }
    return
  }
  func.func @transform_0(%arg0: i32, %arg1: i32) -> (i32, i32, i32) {
    %c0_i32 = arith.constant 0 : i32
    %c0_i32_0 = arith.constant 0 : i32
    return %arg0, %arg1, %c0_i32 : i32, i32, i32
  }
  func.func @transform_1(%arg0: i32, %arg1: i32) -> (i32, i32) {
    %c0_i32 = arith.constant 0 : i32
    return %arg0, %arg1 : i32, i32
  }
  func.func @transform_2(%arg0: i32, %arg1: i32) -> (i32, i32) {
    %c0_i32 = arith.constant 0 : i32
    %c0_i32_0 = arith.constant 0 : i32
    return %arg0, %c0_i32 : i32, i32
  }
  func.func @transform_3(%arg0: i32, %arg1: i32) -> (i32, i32) {
    %c0_i32 = arith.constant 0 : i32
    %c0_i32_0 = arith.constant 0 : i32
    %c0_i32_1 = arith.constant 0 : i32
    return %c0_i32, %c0_i32_0 : i32, i32
  }
  func.func @transform_4(%arg0: i32, %arg1: i32) -> (i32, i32) {
    %c0_i32 = arith.constant 0 : i32
    %c0_i32_0 = arith.constant 0 : i32
    return %arg0, %c0_i32 : i32, i32
  }
}

</mosaic_0001>

<bundles_post_ra>
// kernel: tpu_custom_call.1
= control target key start
LH: loop header
LB: loop body
LE: loop exit
PB: predicated region body
PF: predicated region fallthrough
CT: control target
= control target key end

     0   :  { %9 = vsyncpa [#allocation4], 0  ;;  %s1748_s0 = inlined_call_operand.hbm [shape: bf16[2,256,128], index: 0, kind: input, shape index: {}]   ;;  %s1749_s1 = inlined_call_operand.vmem [shape: f32[2,256], index: 1, kind: input, shape index: {}]   ;;  %s1750_s2 = inlined_call_operand.vmem [shape: f32[2,1], index: 2, kind: input, shape index: {}]   ;;  %s1751_s3 = inlined_call_operand.vmem [shape: f32[1,128], index: 3, kind: input, shape index: {}]   ;;  %s1752_s4 = inlined_call_operand.vmem [shape: f32[2,1], index: 4, kind: output, shape index: {}]  }
   0x1   :  { %11 = vsyncpa [#allocation4 + $0x1], 0  ;;  %s1377_s15 = smov 0   ;;  %s1379_s16 = smov 0  }
   0x2   :  { %s1381_s17 = smov 0   ;;  %s1383_s18 = smov 0  }
   0x3   :  { %s1385_s19 = smov 0   ;;  %s1387_s20 = smov 0  }
   0x4 LB: > { %s1126_s21 = sadd.s32 4294967295, %s1342_s20   ;;  %s26_s22 = sadd.s32 1, %s1338_s19  ;;  %s1342_s20 = sphi %s1387_s20, %s17_s20   ;;  %s1338_s19 = sphi %s1385_s19, %s1759_s19   ;;  %s1334_s18 = sphi %s1383_s18, %s1758_s18   ;;  %s1330_s17 = sphi %s1381_s17, %s1757_s17   ;;  %s1326_s16 = sphi %s1379_s16, %s1756_s16   ;;  %s1322_s15 = sphi %s1377_s15, %s1755_s15  }
   0x5   : > { %p27_p0 = scmp.ge.s32.totalorder %s26_s22, 2  ;;  %s38_s23 = sadd.s32 1, %s1330_s17 }
   0x6   : > { %p45_p1 = scmp.ne.s32.totalorder %s1330_s17, %s1326_s16  ;;  %p46_p2 = scmp.eq.s32.totalorder %s1342_s20, 0 }
   0x7   : > { %s1761_s22 = smov (%p27_p0, %s26_s22), 0  ;;  %p51_p4 = scmp.ne.s32.totalorder %s1326_s16, %s1322_s15 }
   0x8   : > { %p1413_p3 = por %p46_p2, %p45_p1  ;;  %s34_s25 = ssub.s32 %s1338_s19, %s1761_s22 }
   0x9   : > { %p52_p5 = scmp.eq.s32.totalorder %s1126_s21, 0  ;;  %p36_p6 = scmp.eq.s32.totalorder %s34_s25, 0 }
   0xa   : > { %p1129_p8 = scmp.ge.s32.totalorder %s1342_s20, 2 }
   0xb   : > { %p1420_p7 = por %p52_p5, %p51_p4 }
   0xc   : > { %s1425_s27 = scalar_select %p36_p6, %s1330_s17, %s38_s23  }
   0xd   : > { %182 = sbr.rel (%p1129_p8) target bundleno = 33 (0x21), region = 24 }
  0x14   : > { %s186_s28 = sand.u32 1, %s1330_s17   ;;  %s1145_s29 = sshll.u32 %s1338_s19, 10 }
  0x15   : > { %s1130_s30 = sshll.u32 %s186_s28, 7  ;;  %s199_s7 = scalar_lea.hbm %s1748_s0, %s1145_s29 }
  0x16   : > { %s1225_s8 = scalar_select %p1413_p3, [#allocation0], [#allocation7] }
  0x17   : > { %s190_s9 = scalar_lea.vmem [#allocation3], %s1130_s30  ;;  %s1344_s12 = smov 2048  }
  0x18   : > { %s212_s10 = sshll.u32 %s190_s9, 4  ;;  %s204_s11 = sld [smem:[%s1225_s8]]   ;;  %s213_s10 = int_to_ptr.vmem [resolvable:$true] %s212_s10 }
  0x19   : > { %1226 = sst [smem:[#allocation6]] (%p1413_p3), %s1344_s12  ;;  %s1345_s13 = smov 1024  }
  0x1a   : > { %1227 = sst [smem:[#allocation6 + $0x1]] (%p1413_p3), %s1345_s13  ;;  %s1346_s14 = smov 16  }
  0x1b   : > { %1228 = sst [smem:[#allocation6 + $0x2]] (%p1413_p3), %s1346_s14  ;;  %s1347_s15 = smov 64  }
  0x1c   : > { %1229 = sst [smem:[#allocation6 + $0x3]] (%p1413_p3), %s1347_s15  ;;  %s1348_s23 = smov 4  }
  0x1d   : > { %1230 = sst [smem:[#allocation6 + $0x4]] (%p1413_p3), %s1347_s15  ;;  %s187_s29 = scalar_lea.sflag [#allocation4], %s186_s28 }
  0x1e   : > { %s1133_s21 = sshll.u32 %s204_s11, 26  ;;  %1231 = sst [smem:[#allocation6 + $0x5]] (%p1413_p3), %s1348_s23 }
  0x1f   : > { %s1134_s25 = sadd.s32 134217728, %s1133_s21  ;;  %s1349_s30 = smov [#allocation5]  }
  0x20   : > { %1232 = dma.general (%p1413_p3), %s199_s7, 2048, %s213_s10, %s187_s29, %s1349_s30, [#allocation6], %s1134_s25, 0  }
  0x21 PF: > { %p1135_p9 = scmp.ge.s32.totalorder %s1342_s20, 1  ;;  %p244_p10 = scmp.lt.s32.totalorder %s1342_s20, 3 }
  0x23   : > { %p245_p11 = pnand %p1135_p9, %p244_p10 }
  0x24   : > { %s250_s5 = sand.u32 (!%p245_p11), 1, %s1326_s16  }
  0x25   : > { %248 = sbr.rel (%p245_p11) target bundleno = 622 (0x26e), region = 36  ;;  %s1136_s6 = sshll.u32 (!%p245_p11), %s250_s5, 7 }
  0x26   : > { %s251_s8 = scalar_lea.sflag (!%p245_p11), [#allocation4], %s250_s5  ;;  %s1452_s9 = scalar_lea.vmem (!%p245_p11), [#allocation3], %s1136_s6 }
  0x2c   : > { %1317 = dma.done.wait (%p1420_p7), %s251_s8, 2048  }
  0x2d   : > { %1319 = vsyncadd (%p1420_p7), %s251_s8, 4294965248  ;;  %p294_p12 = scmp.lt.s32.totalorder %s1334_s18, 1  ;;  %p1138_p13 = scmp.ne.s32.totalorder %s1334_s18, 0 }
  0x2e   : > { %vm312_vm0 = vcmask (!%p1138_p13), 1024   ;;  %v1350_v0 = vmov (!%p1138_p13), 0.0  }
  0x2f   : > { %s295_s24 = scalar_select %p294_p12, %s1334_s18, 1 }
  0x30   : > { %311 = sbr.rel (%p1138_p13) target bundleno = 55 (0x37), region = 44  ;;  %313 = vst.msk [vmem:[#allocation2] sm:$0x3] (!%p1138_p13), %vm312_vm0, %v1350_v0 }
  0x31   : > { %s1137_s28 = sshll.u32 %s295_s24, 1 }
  0x32   : > { %s1463_s11 = scalar_lea.vmem %s1749_s1, %s1137_s28 }
  0x37 PF: > { %v1210_v1 = vld [vmem:[%s1452_s9 + $0x8] sm:$0xff]   ;;  %v1470_v2 = vld [vmem:[%s1751_s3] ss:$0 sm:$0xff]  ;;  %v1147_v3 = vld [vmem:[%s1452_s9] sm:$0xff]   ;;  %vm821_vm1 = vcmask 130112   ;;  %vm828_vm2 = vcmask 195712  }
  0x38   : > { %v1152_v4 = vunpack.c.l.bf16 %v1210_v1  ;;  %v1148_v5 = vunpack.c.l.bf16 %v1147_v3  ;;  %v1153_v6 = vunpack.c.h.bf16 %v1210_v1  ;;  %v1149_v7 = vunpack.c.h.bf16 %v1147_v3  ;;  %v1211_v8 = vld [vmem:[%s1452_s9 + $0x10] sm:$0xff]   ;;  %v1212_v15 = vld [vmem:[%s1452_s9 + $0x18] sm:$0xff]   ;;  %v1213_v20 = vld [vmem:[%s1452_s9 + $0x20] sm:$0xff]   ;;  %p1140_p0 = scmp.ne.s32.totalorder %s1334_s18, 1 }
  0x39   : > { %v1157_v13 = vunpack.c.h.bf16 %v1211_v8  ;;  %v1156_v14 = vunpack.c.l.bf16 %v1211_v8  ;;  %v1161_v18 = vunpack.c.h.bf16 %v1212_v15  ;;  %v1160_v19 = vunpack.c.l.bf16 %v1212_v15  ;;  %v1214_v25 = vld [vmem:[%s1452_s9 + $0x28] sm:$0xff]   ;;  %v1215_v30 = vld [vmem:[%s1452_s9 + $0x30] sm:$0xff]   ;;  %v1216_v35 = vld [vmem:[%s1452_s9 + $0x38] sm:$0xff]  }
  0x3a   : > { %v388_v9 = vmul.f32 %v1152_v4, %v1470_v2  ;;  %v386_v10 = vmul.f32 %v1148_v5, %v1470_v2  ;;  %v389_v11 = vmul.f32 %v1153_v6, %v1470_v2  ;;  %v387_v12 = vmul.f32 %v1149_v7, %v1470_v2  ;;  %v1217_v40 = vld [vmem:[%s1452_s9 + $0x40] sm:$0xff]   ;;  %v1218_v45 = vld [vmem:[%s1452_s9 + $0x48] sm:$0xff]   ;;  %v1219_v50 = vld [vmem:[%s1452_s9 + $0x50] sm:$0xff]  }
  0x3b   : > { %v391_v16 = vmul.f32 %v1157_v13, %v1470_v2  ;;  %v390_v17 = vmul.f32 %v1156_v14, %v1470_v2  ;;  %v393_v21 = vmul.f32 %v1161_v18, %v1470_v2  ;;  %v392_v22 = vmul.f32 %v1160_v19, %v1470_v2  ;;  %v1220_v55 = vld [vmem:[%s1452_s9 + $0x58] sm:$0xff]   ;;  %v1221_v60 = vld [vmem:[%s1452_s9 + $0x60] sm:$0xff]   ;;  %v1222_v1 = vld [vmem:[%s1452_s9 + $0x68] sm:$0xff]  }
  0x3c   : > { %422 = vadd.xlane.f32.xlu1 %v388_v9  ;;  %418 = vadd.xlane.f32.xlu0 %v386_v10  ;;  %v1165_v23 = vunpack.c.h.bf16 %v1213_v20  ;;  %v1164_v24 = vunpack.c.l.bf16 %v1213_v20  ;;  %v1169_v28 = vunpack.c.h.bf16 %v1214_v25  ;;  %v1168_v29 = vunpack.c.l.bf16 %v1214_v25  ;;  %v1223_v7 = vld [vmem:[%s1452_s9 + $0x70] sm:$0xff]  }
  0x3d   : > { %v1173_v33 = vunpack.c.h.bf16 %v1215_v30  ;;  %v1172_v34 = vunpack.c.l.bf16 %v1215_v30  ;;  %v1177_v38 = vunpack.c.h.bf16 %v1216_v35  ;;  %v1176_v39 = vunpack.c.l.bf16 %v1216_v35 }
  0x3e   : > { %v395_v26 = vmul.f32 %v1165_v23, %v1470_v2  ;;  %v394_v27 = vmul.f32 %v1164_v24, %v1470_v2  ;;  %v397_v31 = vmul.f32 %v1169_v28, %v1470_v2  ;;  %v396_v32 = vmul.f32 %v1168_v29, %v1470_v2 }
  0x3f   : > { %v399_v36 = vmul.f32 %v1173_v33, %v1470_v2  ;;  %v398_v37 = vmul.f32 %v1172_v34, %v1470_v2  ;;  %v401_v41 = vmul.f32 %v1177_v38, %v1470_v2  ;;  %v400_v42 = vmul.f32 %v1176_v39, %v1470_v2 }
  0x40   : > { %424 = vadd.xlane.f32.xlu1 %v389_v11  ;;  %420 = vadd.xlane.f32.xlu0 %v387_v12  ;;  %v1181_v43 = vunpack.c.h.bf16 %v1217_v40  ;;  %v1180_v44 = vunpack.c.l.bf16 %v1217_v40  ;;  %v1185_v48 = vunpack.c.h.bf16 %v1218_v45  ;;  %v1184_v49 = vunpack.c.l.bf16 %v1218_v45  ;;  %v1224_v12 = vld [vmem:[%s1452_s9 + $0x78] sm:$0xff]  }
  0x41   : > { %v1189_v53 = vunpack.c.h.bf16 %v1219_v50  ;;  %v1188_v54 = vunpack.c.l.bf16 %v1219_v50  ;;  %v1193_v58 = vunpack.c.h.bf16 %v1220_v55  ;;  %v1192_v59 = vunpack.c.l.bf16 %v1220_v55 }
  0x42   : > { %v403_v46 = vmul.f32 %v1181_v43, %v1470_v2  ;;  %v402_v47 = vmul.f32 %v1180_v44, %v1470_v2  ;;  %v405_v51 = vmul.f32 %v1185_v48, %v1470_v2  ;;  %v404_v52 = vmul.f32 %v1184_v49, %v1470_v2 }
  0x43   : > { %v407_v56 = vmul.f32 %v1189_v53, %v1470_v2  ;;  %v406_v57 = vmul.f32 %v1188_v54, %v1470_v2  ;;  %v409_v61 = vmul.f32 %v1193_v58, %v1470_v2  ;;  %v408_v62 = vmul.f32 %v1192_v59, %v1470_v2 }
  0x44   : > { %428 = vadd.xlane.f32.xlu1 %v391_v16  ;;  %426 = vadd.xlane.f32.xlu0 %v390_v17  ;;  %v1197_v63 = vunpack.c.h.bf16 %v1221_v60  ;;  %v1196_v0 = vunpack.c.l.bf16 %v1221_v60  ;;  %v1201_v5 = vunpack.c.h.bf16 %v1222_v1  ;;  %v1200_v6 = vunpack.c.l.bf16 %v1222_v1 }
  0x45   : > { %v1205_v10 = vunpack.c.h.bf16 %v1223_v7  ;;  %v1204_v11 = vunpack.c.l.bf16 %v1223_v7  ;;  %v1209_v15 = vunpack.c.h.bf16 %v1224_v12  ;;  %v1208_v16 = vunpack.c.l.bf16 %v1224_v12 }
  0x46   : > { %v411_v3 = vmul.f32 %v1197_v63, %v1470_v2  ;;  %v410_v4 = vmul.f32 %v1196_v0, %v1470_v2  ;;  %v413_v8 = vmul.f32 %v1201_v5, %v1470_v2  ;;  %v412_v9 = vmul.f32 %v1200_v6, %v1470_v2 }
  0x47   : > { %v415_v13 = vmul.f32 %v1205_v10, %v1470_v2  ;;  %v414_v14 = vmul.f32 %v1204_v11, %v1470_v2  ;;  %v417_v17 = vmul.f32 %v1209_v15, %v1470_v2  ;;  %v416_v18 = vmul.f32 %v1208_v16, %v1470_v2 }
  0x48   : > { %432 = vadd.xlane.f32.xlu1 %v393_v21  ;;  %430 = vadd.xlane.f32.xlu0 %v392_v22  ;;  %v484_v19 = vlaneseq  ;;  %v347_v22 = vld [vmem:[%s1463_s11] sm:$0x3]  ;;  %vm835_vm3 = vcmask 261312   ;;  %vm842_vm4 = vcmask 326912   ;;  %vm849_vm5 = vcmask 392512  }
  0x49   : > { %vm856_vm6 = vcmask 458112   ;;  %vm863_vm7 = vcmask 523712   ;;  %vm870_vm8 = vcmask 589312   ;;  %vm877_vm9 = vcmask 654912  }
  0x4a   : > { %v1520_v20 = vshrl.u32 %v484_v19, 7  ;;  %vm884_vm10 = vcmask 720512   ;;  %vm891_vm11 = vcmask 786112   ;;  %vm898_vm12 = vcmask 851712  }
  0x4b   : > { %vm905_vm13 = vcmask 917312   ;;  %vm912_vm14 = vcmask 982912   ;;  %vm919_vm15 = vcmask 1048512   ;;  %vm1000_vm0 = vcmask 1041409  }
  0x4c   : > { %436 = vadd.xlane.f32.xlu1 %v395_v26  ;;  %434 = vadd.xlane.f32.xlu0 %v394_v27  ;;  %v486_v21 = vsub.s32 0, %v1520_v20  ;;  %v553_v24 = vsub.s32 1, %v1520_v20  ;;  %v1351_v26 = vmov 0  }
  0x4d   : > { %1291 = vset.pattern.permute.xlu1 %v1351_v26  ;;  %1290 = vset.pattern.permute.xlu0 %v1351_v26 }
  0x4e   : > { %v487_v23 = vrot.slane %v347_v22, %v486_v21  ;;  %v554_v25 = vrot.slane %v347_v22, %v553_v24 }
  0x50   : > { %440 = vadd.xlane.f32.xlu1 %v397_v31  ;;  %438 = vadd.xlane.f32.xlu0 %v396_v32 }
  0x54   : > { %444 = vadd.xlane.f32.xlu1 %v399_v36  ;;  %442 = vadd.xlane.f32.xlu0 %v398_v37 }
  0x58   : > { %448 = vadd.xlane.f32.xlu1 %v401_v41  ;;  %446 = vadd.xlane.f32.xlu0 %v400_v42 }
  0x5c   : > { %452 = vadd.xlane.f32.xlu1 %v403_v46  ;;  %450 = vadd.xlane.f32.xlu0 %v402_v47 }
  0x60   : > { %456 = vadd.xlane.f32.xlu1 %v405_v51  ;;  %454 = vadd.xlane.f32.xlu0 %v404_v52 }
  0x64   : > { %460 = vadd.xlane.f32.xlu1 %v407_v56  ;;  %458 = vadd.xlane.f32.xlu0 %v406_v57 }
  0x68   : > { %464 = vadd.xlane.f32.xlu1 %v409_v61  ;;  %462 = vadd.xlane.f32.xlu0 %v408_v62 }
  0x6c   : > { %468 = vadd.xlane.f32.xlu1 %v411_v3  ;;  %466 = vadd.xlane.f32.xlu0 %v410_v4 }
  0x70   : > { %472 = vadd.xlane.f32.xlu1 %v413_v8  ;;  %470 = vadd.xlane.f32.xlu0 %v412_v9 }
  0x74   : > { %476 = vadd.xlane.f32.xlu1 %v415_v13  ;;  %474 = vadd.xlane.f32.xlu0 %v414_v14 }
  0x78   : > { %480 = vadd.xlane.f32.xlu1 %v417_v17  ;;  %478 = vadd.xlane.f32.xlu0 %v416_v18 }
  0x89   : > { %493 = vbcast.lane.b32.xlu1 %v487_v23, 264 }
  0x8d   : > { %556 = vbcast.lane.b32.xlu1 %v554_v25, 256 }
  0x8e   : > { %489 = vbcast.lane.b32.xlu0 %v487_v23, 256 }
  0x91   : > { %560 = vbcast.lane.b32.xlu1 %v554_v25, 264 }
  0x92   : > { %497 = vbcast.lane.b32.xlu0 %v487_v23, 272 }
  0x95   : > { %564 = vbcast.lane.b32.xlu1 %v554_v25, 272 }
  0x96   : > { %501 = vbcast.lane.b32.xlu0 %v487_v23, 280 }
  0x99   : > { %568 = vbcast.lane.b32.xlu1 %v554_v25, 280 }
  0x9a   : > { %505 = vbcast.lane.b32.xlu0 %v487_v23, 288 }
  0x9d   : > { %572 = vbcast.lane.b32.xlu1 %v554_v25, 288 }
  0x9e   : > { %509 = vbcast.lane.b32.xlu0 %v487_v23, 296 }
  0xa1   : > { %576 = vbcast.lane.b32.xlu1 %v554_v25, 296 }
  0xa2   : > { %513 = vbcast.lane.b32.xlu0 %v487_v23, 304 }
  0xa5   : > { %580 = vbcast.lane.b32.xlu1 %v554_v25, 304 }
  0xa6   : > { %517 = vbcast.lane.b32.xlu0 %v487_v23, 312 }
  0xa9   : > { %584 = vbcast.lane.b32.xlu1 %v554_v25, 312 }
  0xaa   : > { %521 = vbcast.lane.b32.xlu0 %v487_v23, 320 }
  0xad   : > { %588 = vbcast.lane.b32.xlu1 %v554_v25, 320 }
  0xae   : > { %525 = vbcast.lane.b32.xlu0 %v487_v23, 328 }
  0xb1   : > { %592 = vbcast.lane.b32.xlu1 %v554_v25, 328 }
  0xb2   : > { %529 = vbcast.lane.b32.xlu0 %v487_v23, 336 }
  0xb5   : > { %596 = vbcast.lane.b32.xlu1 %v554_v25, 336 }
  0xb6   : > { %533 = vbcast.lane.b32.xlu0 %v487_v23, 344 }
  0xb9   : > { %600 = vbcast.lane.b32.xlu1 %v554_v25, 344 }
  0xba   : > { %537 = vbcast.lane.b32.xlu0 %v487_v23, 352 }
  0xbd   : > { %604 = vbcast.lane.b32.xlu1 %v554_v25, 352 }
  0xbe   : > { %541 = vbcast.lane.b32.xlu0 %v487_v23, 360 }
  0xc1   : > { %608 = vbcast.lane.b32.xlu1 %v554_v25, 360 }
  0xc2   : > { %545 = vbcast.lane.b32.xlu0 %v487_v23, 368 }
  0xc5   : > { %612 = vbcast.lane.b32.xlu1 %v554_v25, 368 }
  0xc6   : > { %549 = vbcast.lane.b32.xlu0 %v487_v23, 376 }
  0xc9   : > { %v423_v2 = vpop.xlane.xlu1 %422  ;;  %v419_v27 = vpop.xlane.xlu0 %418  ;;  %616 = vbcast.lane.b32.xlu1 %v554_v25, 376 }
  0xcd   : > { %v425_v28 = vpop.xlane.xlu1 %424  ;;  %v421_v29 = vpop.xlane.xlu0 %420 }
  0xd1   : > { %v429_v30 = vpop.xlane.xlu1 %428  ;;  %v427_v31 = vpop.xlane.xlu0 %426 }
  0xd5   : > { %v1525_v32 = vpop.xlane.xlu1 %432  ;;  %v431_v33 = vpop.xlane.xlu0 %430 }
  0xd9   : > { %v1527_v34 = vpop.xlane.xlu1 %436  ;;  %v1529_v35 = vpop.xlane.xlu0 %434 }
  0xdd   : > { %v1531_v36 = vpop.xlane.xlu1 %440  ;;  %v1533_v37 = vpop.xlane.xlu0 %438 }
  0xe1   : > { %v1535_v38 = vpop.xlane.xlu1 %444  ;;  %v1537_v39 = vpop.xlane.xlu0 %442 }
  0xe5   : > { %v1539_v40 = vpop.xlane.xlu1 %448  ;;  %v1541_v41 = vpop.xlane.xlu0 %446 }
  0xe9   : > { %v453_v42 = vpop.xlane.xlu1 %452  ;;  %v451_v43 = vpop.xlane.xlu0 %450 }
  0xed   : > { %v457_v44 = vpop.xlane.xlu1 %456  ;;  %v455_v45 = vpop.xlane.xlu0 %454 }
  0xf1   : > { %v461_v46 = vpop.xlane.xlu1 %460  ;;  %v459_v47 = vpop.xlane.xlu0 %458 }
  0xf5   : > { %v465_v48 = vpop.xlane.xlu1 %464  ;;  %v463_v49 = vpop.xlane.xlu0 %462 }
  0xf9   : > { %v1543_v50 = vpop.xlane.xlu1 %468  ;;  %v467_v51 = vpop.xlane.xlu0 %466 }
  0xfd   : > { %v1545_v52 = vpop.xlane.xlu1 %472  ;;  %v1547_v53 = vpop.xlane.xlu0 %470 }
 0x101   : > { %v1549_v54 = vpop.xlane.xlu1 %476  ;;  %v1551_v55 = vpop.xlane.xlu0 %474 }
 0x105   : > { %v1553_v56 = vpop.xlane.xlu1 %480  ;;  %v1555_v57 = vpop.xlane.xlu0 %478 }
 0x109   : > { %v494_v58 = vpop.permute.xlu1 %493  ;;  %v490_v59 = vpop.permute.xlu0 %489 }
 0x10a   : > { %v651_v60 = vmul.f32 %v494_v58, %v421_v29  ;;  %v650_v61 = vmul.f32 %v490_v59, %v419_v27 }
 0x10c   : > { %718 = vperm.xlu1 %1291, %v651_v60   ;;  %715 = vperm.xlu0 %1290, %v650_v61  }
 0x10d   : > { %v557_v62 = vpop.permute.xlu1 %556  ;;  %v498_v63 = vpop.permute.xlu0 %497 }
 0x10e   : > { %v666_v0 = vmul.f32 %v557_v62, %v451_v43  ;;  %v652_v4 = vmul.f32 %v498_v63, %v423_v2 }
 0x110   : > { %763 = vperm.xlu1 %1291, %v666_v0  }
 0x111   : > { %v561_v1 = vpop.permute.xlu1 %560  ;;  %v502_v3 = vpop.permute.xlu0 %501 }
 0x112   : > { %v667_v5 = vmul.f32 %v561_v1, %v453_v42  ;;  %v653_v8 = vmul.f32 %v502_v3, %v425_v28 }
 0x114   : > { %766 = vperm.xlu0 %1290, %v667_v5   ;;  %721 = vperm.xlu1 %1291, %v652_v4  }
 0x115   : > { %v565_v6 = vpop.permute.xlu1 %564  ;;  %v506_v7 = vpop.permute.xlu0 %505 }
 0x116   : > { %v668_v9 = vmul.f32 %v565_v6, %v455_v45  ;;  %v654_v12 = vmul.f32 %v506_v7, %v427_v31 }
 0x118   : > { %769 = vperm.xlu0 %1290, %v668_v9   ;;  %724 = vperm.xlu1 %1291, %v653_v8  }
 0x119   : > { %v569_v10 = vpop.permute.xlu1 %568  ;;  %v510_v11 = vpop.permute.xlu0 %509 }
 0x11a   : > { %v669_v13 = vmul.f32 %v569_v10, %v457_v44  ;;  %v655_v16 = vmul.f32 %v510_v11, %v429_v30 }
 0x11c   : > { %772 = vperm.xlu0 %1290, %v669_v13   ;;  %727 = vperm.xlu1 %1291, %v654_v12  }
 0x11d   : > { %v573_v14 = vpop.permute.xlu1 %572  ;;  %v514_v15 = vpop.permute.xlu0 %513 }
 0x11e   : > { %v670_v17 = vmul.f32 %v573_v14, %v459_v47  ;;  %v656_v22 = vmul.f32 %v514_v15, %v431_v33  ;;  %v811_v14 = vand.u32 127, %v484_v19 }
 0x120   : > { %775 = vperm.xlu0 %1290, %v670_v17   ;;  %730 = vperm.xlu1 %1291, %v655_v16   ;;  %v816_v17 = vadd.s32 4294967288, %v811_v14  ;;  %v851_v19 = vadd.s32 4294967248, %v811_v14 }
 0x121   : > { %v577_v18 = vpop.permute.xlu1 %576  ;;  %v518_v21 = vpop.permute.xlu0 %517 }
 0x122   : > { %v671_v23 = vmul.f32 %v577_v18, %v461_v46  ;;  %v657_v26 = vmul.f32 %v518_v21, %v1525_v32  ;;  %v823_v18 = vadd.s32 4294967280, %v811_v14  ;;  %v830_v21 = vadd.s32 4294967272, %v811_v14 }
 0x124   : > { %778 = vperm.xlu0 %1290, %v671_v23   ;;  %733 = vperm.xlu1 %1291, %v656_v22  }
 0x125   : > { %v581_v24 = vpop.permute.xlu1 %580  ;;  %v522_v25 = vpop.permute.xlu0 %521 }
 0x126   : > { %v672_v2 = vmul.f32 %v581_v24, %v463_v49  ;;  %v658_v29 = vmul.f32 %v522_v25, %v1529_v35  ;;  %v837_v24 = vadd.s32 4294967264, %v811_v14  ;;  %v819_v25 = vsub.s32 %v816_v17, %v1520_v20 }
 0x128   : > { %781 = vperm.xlu0 %1290, %v672_v2   ;;  %736 = vperm.xlu1 %1291, %v657_v26   ;;  %v814_v26 = vsub.s32 %v811_v14, %v1520_v20  ;;  %v844_v2 = vadd.s32 4294967256, %v811_v14 }
 0x129   : > { %v585_v27 = vpop.permute.xlu1 %584  ;;  %v526_v28 = vpop.permute.xlu0 %525 }
 0x12a   : > { %v673_v30 = vmul.f32 %v585_v27, %v465_v48  ;;  %v659_v33 = vmul.f32 %v526_v28, %v1527_v34  ;;  %v858_v27 = vadd.s32 4294967240, %v811_v14  ;;  %v826_v28 = vsub.s32 %v823_v18, %v1520_v20 }
 0x12c   : > { %784 = vperm.xlu0 %1290, %v673_v30   ;;  %739 = vperm.xlu1 %1291, %v658_v29   ;;  %v833_v29 = vsub.s32 %v830_v21, %v1520_v20  ;;  %v865_v30 = vadd.s32 4294967232, %v811_v14 }
 0x12d   : > { %v589_v31 = vpop.permute.xlu1 %588  ;;  %v530_v42 = vpop.permute.xlu0 %529 }
 0x12e   : > { %v674_v43 = vmul.f32 %v589_v31, %v467_v51  ;;  %v660_v32 = vmul.f32 %v530_v42, %v1533_v37  ;;  %v872_v31 = vadd.s32 4294967224, %v811_v14 }
 0x130   : > { %787 = vperm.xlu0 %1290, %v674_v43   ;;  %742 = vperm.xlu1 %1291, %v659_v33   ;;  %v840_v43 = vsub.s32 %v837_v24, %v1520_v20 }
 0x131   : > { %v593_v44 = vpop.permute.xlu1 %592  ;;  %v534_v45 = vpop.permute.xlu0 %533 }
 0x132   : > { %v675_v46 = vmul.f32 %v593_v44, %v1543_v50  ;;  %v661_v48 = vmul.f32 %v534_v45, %v1531_v36  ;;  %v879_v44 = vadd.s32 4294967216, %v811_v14  ;;  %v847_v45 = vsub.s32 %v844_v2, %v1520_v20 }
 0x134   : > { %790 = vperm.xlu0 %1290, %v675_v46   ;;  %745 = vperm.xlu1 %1291, %v660_v32   ;;  %v886_v32 = vadd.s32 4294967208, %v811_v14  ;;  %v893_v46 = vadd.s32 4294967200, %v811_v14 }
 0x135   : > { %v597_v47 = vpop.permute.xlu1 %596  ;;  %v538_v35 = vpop.permute.xlu0 %537 }
 0x136   : > { %v676_v49 = vmul.f32 %v597_v47, %v1547_v53  ;;  %v662_v58 = vmul.f32 %v538_v35, %v1537_v39  ;;  %v854_v47 = vsub.s32 %v851_v19, %v1520_v20  ;;  %v861_v35 = vsub.s32 %v858_v27, %v1520_v20 }
 0x138   : > { %793 = vperm.xlu0 %1290, %v676_v49   ;;  %748 = vperm.xlu1 %1291, %v661_v48   ;;  %v900_v48 = vadd.s32 4294967192, %v811_v14  ;;  %v1629_v49 = vsub.s32 %v865_v30, %v1520_v20 }
 0x139   : > { %v601_v34 = vpop.permute.xlu1 %600  ;;  %v542_v51 = vpop.permute.xlu0 %541 }
 0x13a   : > { %v677_v59 = vmul.f32 %v601_v34, %v1545_v52  ;;  %v663_v60 = vmul.f32 %v542_v51, %v1535_v38  ;;  %v1632_v34 = vsub.s32 %v872_v31, %v1520_v20 }
 0x13c   : > { %796 = vperm.xlu0 %1290, %v677_v59   ;;  %751 = vperm.xlu1 %1291, %v662_v58   ;;  %v907_v59 = vadd.s32 4294967184, %v811_v14 }
 0x13d   : > { %v605_v37 = vpop.permute.xlu1 %604  ;;  %v546_v50 = vpop.permute.xlu0 %545 }
 0x13e   : > { %v678_v61 = vmul.f32 %v605_v37, %v1551_v55  ;;  %v664_v53 = vmul.f32 %v546_v50, %v1541_v41  ;;  %v914_v37 = vadd.s32 4294967176, %v811_v14 }
 0x140   : > { %799 = vperm.xlu0 %1290, %v678_v61   ;;  %754 = vperm.xlu1 %1291, %v663_v60  }
 0x141   : > { %v609_v36 = vpop.permute.xlu1 %608  ;;  %v550_v63 = vpop.permute.xlu0 %549 }
 0x142   : > { %v679_v62 = vmul.f32 %v609_v36, %v1549_v54  ;;  %v665_v52 = vmul.f32 %v550_v63, %v1539_v40  ;;  %v1642_v36 = vsub.s32 %v879_v44, %v1520_v20  ;;  %v1647_v63 = vsub.s32 %v886_v32, %v1520_v20 }
 0x144   : > { %802 = vperm.xlu0 %1290, %v679_v62   ;;  %757 = vperm.xlu1 %1291, %v664_v53  }
 0x145   : > { %v613_v39 = vpop.permute.xlu1 %612 }
 0x146   : > { %v680_v0 = vmul.f32 %v613_v39, %v1555_v57  ;;  %v1650_v39 = vsub.s32 %v893_v46, %v1520_v20 }
 0x148   : > { %805 = vperm.xlu0 %1290, %v680_v0   ;;  %760 = vperm.xlu1 %1291, %v665_v52  }
 0x149   : > { %v617_v38 = vpop.permute.xlu1 %616 }
 0x14a   : > { %v681_v55 = vmul.f32 %v617_v38, %v1553_v56 }
 0x14c   : > { %808 = vperm.xlu0 %1290, %v681_v55   ;;  %v1656_v55 = vsub.s32 %v900_v48, %v1520_v20 }
 0x18b   : > { %v1573_v1 = vpop.permute.xlu1 %718  ;;  %v1575_v3 = vpop.permute.xlu0 %715 }
 0x18c   : > { %v820_v50 = vrot.slane %v1573_v1, %v819_v25  ;;  %v815_v60 = vrot.slane %v1575_v3, %v814_v26 }
 0x18f   : > { %v1577_v41 = vpop.permute.xlu1 %763 }
 0x190   : > { %v924_v52 = vrot.slane %v1577_v41, %v814_v26  ;;  %v1664_v41 = vsub.s32 %v914_v37, %v1520_v20 }
 0x193   : > { %v1579_v54 = vpop.permute.xlu1 %721  ;;  %v1581_v4 = vpop.permute.xlu0 %766 }
 0x194   : > { %v928_v61 = vrot.slane %v1581_v4, %v819_v25  ;;  %v827_v53 = vrot.slane %v1579_v54, %v826_v28 }
 0x197   : > { %v1583_v5 = vpop.permute.xlu1 %724  ;;  %v1585_v40 = vpop.permute.xlu0 %769 }
 0x198   : > { %v933_v62 = vrot.slane %v1585_v40, %v826_v28  ;;  %v834_v0 = vrot.slane %v1583_v5, %v833_v29  ;;  %v1661_v40 = vsub.s32 %v907_v59, %v1520_v20  ;;  %v822_v5 = vsel %vm821_vm1, %v820_v50, %v815_v60 }
 0x19b   : > { %v1587_v57 = vpop.permute.xlu1 %727  ;;  %v1589_v6 = vpop.permute.xlu0 %772 }
 0x19c   : > { %v938_v38 = vrot.slane %v1589_v6, %v833_v29  ;;  %v841_v1 = vrot.slane %v1587_v57, %v840_v43  ;;  %v929_v6 = vsel %vm821_vm1, %v928_v61, %v924_v52  ;;  %v829_v57 = vsel %vm828_vm2, %v827_v53, %v822_v5 }
 0x19d   : > { %v836_v20 = vsel %vm835_vm3, %v834_v0, %v829_v57  ;;  %vm1003_vm1 = vcmask 1041408  }
 0x19f   : > { %v1591_v56 = vpop.permute.xlu1 %730  ;;  %v1593_v7 = vpop.permute.xlu0 %775 }
 0x1a0   : > { %v943_v3 = vrot.slane %v1593_v7, %v840_v43  ;;  %v848_v14 = vrot.slane %v1591_v56, %v847_v45  ;;  %v934_v7 = vsel %vm828_vm2, %v933_v62, %v929_v6  ;;  %vm1008_vm2 = vcmask 1024  }
 0x1a1   : > { %v939_v24 = vsel %vm835_vm3, %v938_v38, %v934_v7 }
 0x1a2   : > { %v944_v26 = vsel %vm842_vm4, %v943_v3, %v939_v24  ;;  %v482_v3 = vld [vmem:[#allocation2] sm:$0x3] }
 0x1a3   : > { %v1595_v8 = vpop.permute.xlu1 %733  ;;  %v1597_v9 = vpop.permute.xlu0 %778 }
 0x1a4   : > { %v948_v17 = vrot.slane %v1597_v9, %v847_v45  ;;  %v855_v18 = vrot.slane %v1595_v8, %v854_v47  ;;  %v843_v9 = vsel %vm842_vm4, %v841_v1, %v836_v20 }
 0x1a5   : > { %v850_v27 = vsel %vm849_vm5, %v848_v14, %v843_v9 }
 0x1a6   : > { %v949_v28 = vsel %vm849_vm5, %v948_v17, %v944_v26  ;;  %v857_v29 = vsel %vm856_vm6, %v855_v18, %v850_v27 }
 0x1a7   : > { %v1599_v10 = vpop.permute.xlu1 %736  ;;  %v1601_v11 = vpop.permute.xlu0 %781 }
 0x1a8   : > { %v953_v21 = vrot.slane %v1601_v11, %v854_v47  ;;  %v862_v25 = vrot.slane %v1599_v10, %v861_v35 }
 0x1aa   : > { %v954_v30 = vsel %vm856_vm6, %v953_v21, %v949_v28  ;;  %v864_v31 = vsel %vm863_vm7, %v862_v25, %v857_v29 }
 0x1ab   : > { %v1603_v12 = vpop.permute.xlu1 %739  ;;  %v1605_v13 = vpop.permute.xlu0 %784 }
 0x1ac   : > { %v958_v56 = vrot.slane %v1605_v13, %v861_v35  ;;  %v869_v2 = vrot.slane %v1603_v12, %v1629_v49 }
 0x1ae   : > { %v959_v43 = vsel %vm863_vm7, %v958_v56, %v954_v30  ;;  %v871_v44 = vsel %vm870_vm8, %v869_v2, %v864_v31 }
 0x1af   : > { %v1608_v15 = vpop.permute.xlu1 %742  ;;  %v1610_v16 = vpop.permute.xlu0 %787 }
 0x1b0   : > { %v963_v8 = vrot.slane %v1610_v16, %v1629_v49  ;;  %v876_v10 = vrot.slane %v1608_v15, %v1632_v34 }
 0x1b2   : > { %v964_v45 = vsel %vm870_vm8, %v963_v8, %v959_v43  ;;  %v878_v47 = vsel %vm877_vm9, %v876_v10, %v871_v44 }
 0x1b3   : > { %v1612_v22 = vpop.permute.xlu1 %745  ;;  %v1614_v23 = vpop.permute.xlu0 %790 }
 0x1b4   : > { %v968_v13 = vrot.slane %v1614_v23, %v1632_v34  ;;  %v883_v12 = vrot.slane %v1612_v22, %v1642_v36 }
 0x1b6   : > { %v969_v35 = vsel %vm877_vm9, %v968_v13, %v964_v45  ;;  %v885_v49 = vsel %vm884_vm10, %v883_v12, %v878_v47 }
 0x1b7   : > { %v1620_v42 = vpop.permute.xlu1 %748  ;;  %v1622_v33 = vpop.permute.xlu0 %793 }
 0x1b8   : > { %v973_v16 = vrot.slane %v1622_v33, %v1642_v36  ;;  %v890_v15 = vrot.slane %v1620_v42, %v1647_v63 }
 0x1ba   : > { %v974_v34 = vsel %vm884_vm10, %v973_v16, %v969_v35  ;;  %v892_v59 = vsel %vm891_vm11, %v890_v15, %v885_v49 }
 0x1bb   : > { %v1634_v51 = vpop.permute.xlu1 %751  ;;  %v1636_v58 = vpop.permute.xlu0 %796 }
 0x1bc   : > { %v978_v23 = vrot.slane %v1636_v58, %v1647_v63  ;;  %v897_v22 = vrot.slane %v1634_v51, %v1650_v39 }
 0x1be   : > { %v979_v37 = vsel %vm891_vm11, %v978_v23, %v974_v34  ;;  %v899_v60 = vsel %vm898_vm12, %v897_v22, %v892_v59 }
 0x1bf   : > { %v755_v54 = vpop.permute.xlu1 %754  ;;  %v800_v4 = vpop.permute.xlu0 %799 }
 0x1c0   : > { %v983_v32 = vrot.slane %v800_v4, %v1650_v39  ;;  %v904_v42 = vrot.slane %v755_v54, %v1656_v55 }
 0x1c2   : > { %v984_v61 = vsel %vm898_vm12, %v983_v32, %v979_v37  ;;  %v906_v53 = vsel %vm905_vm13, %v904_v42, %v899_v60 }
 0x1c3   : > { %v758_v11 = vpop.permute.xlu1 %757  ;;  %v803_v19 = vpop.permute.xlu0 %802 }
 0x1c4   : > { %v988_v48 = vrot.slane %v803_v19, %v1656_v55  ;;  %v911_v58 = vrot.slane %v758_v11, %v1661_v40 }
 0x1c6   : > { %v989_v62 = vsel %vm905_vm13, %v988_v48, %v984_v61  ;;  %v913_v39 = vsel %vm912_vm14, %v911_v58, %v906_v53 }
 0x1c7   : > { %v761_v33 = vpop.permute.xlu1 %760  ;;  %v806_v46 = vpop.permute.xlu0 %805 }
 0x1c8   : > { %v993_v51 = vrot.slane %v806_v46, %v1661_v40  ;;  %v918_v50 = vrot.slane %v761_v33, %v1664_v41 }
 0x1ca   : > { %v994_v52 = vsel %vm912_vm14, %v993_v51, %v989_v62  ;;  %v920_v0 = vsel %vm919_vm15, %v918_v50, %v913_v39 }
 0x1cb   : > { %v809_v36 = vpop.permute.xlu0 %808 }
 0x1cc   : > { %v998_v63 = vrot.slane %v809_v36, %v1664_v41  ;;  %v1015_v41 = vld [vmem:[%s1750_s2] sm:$0x3] (!%p1140_p0) }
 0x1ce   : > { %v999_v38 = vsel %vm919_vm15, %v998_v63, %v994_v52 }
 0x1cf   : > { %v1001_v55 = vsel %vm1000_vm0, %v999_v38, %v920_v0 }
 0x1d0   : > { %v1004_v1 = vsel %vm1003_vm1, %v1001_v55, 0.0 }
 0x1d1   : > { %1005 = vadd.xlane.f32.xlu1 %v1004_v1 }
 0x25b   : > { %1013 = sbr.rel (%p1140_p0) target bundleno = 622 (0x26e), region = 48 }
 0x25e   : > { %v1006_v54 = vpop.xlane.xlu1 %1005 }
 0x25f   : > { %v1007_v4 = vadd.f32 %v1006_v54, %v482_v3 }
 0x261   : > { %1009 = vst.msk [vmem:[#allocation2] sm:$0x3] %vm1008_vm2, %v1007_v4 }
 0x268   : > { %v1014_v40 = vld [vmem:[#allocation2] sm:$0x3] }
 0x269   : > { %v1016_v5 = vmul.f32 %v1015_v41, %v1014_v40 }
 0x26b   : > { %v1141_v6 = vclamps-f32 %v1016_v5, 10.0 }
 0x26d   : > { %1019 = vst.msk [vmem:[%s1752_s4] sm:$0x3] %vm1008_vm2, %v1141_v6 }
 0x26e PF: > { %s17_s20 = sadd.s32 1, %s1342_s20   ;;  %s1755_s15 = smov %s1326_s16 }
 0x26f   : > { %p14_p1 = scmp.ge.s32.totalorder %s17_s20, 4   ;;  %s1756_s16 = smov %s1330_s17 }
 0x270   : > { %s1757_s17 = smov %s1425_s27  ;;  %s1758_s18 = smov %s1338_s19 }
 0x271   : > { %s1759_s19 = smov %s1761_s22  ;;  %16 = sbr.rel (!%p14_p1) target bundleno = 4 (0x4), region = 95 }
 0x278   :  { %1039 = vsyncpa [#allocation4], 1 }
 0x279   :  { %1041 = vsyncpa [#allocation4 + $0x1], 1 }

</bundles_post_ra>
